<compile_context>
chip_gen: v5e
topology: v5e:2x2
jax: 0.10.0
libtpu: 0.0.40
codegen_flags: <defaults>
</compile_context>

<pallas_src>
import math

import jax
import jax.numpy as jnp
from jax import lax
from jax.experimental import pallas as pl
from jax.experimental.pallas import tpu as pltpu

# ---- problem sizes (module defaults; dim=128 keeps the single store lane-dense) ----
T_MAX = 240
T_PAD = 256      # K padded to a multiple of 128/256 -> clean unmasked MXU passes
DIM = 128
TILE_M = 256     # batch (M) tile per grid step for the batched path
BATCH = 16       # small demo batch
BATCH_BIG = 1024 # batched-path demo (grid over M, parallel across TCs on v7x)


def rte_kernel(dt_ref, proj_ref, out_ref):
    """One M-tile: gather+Linear fused into a single one-hot MXU matmul."""
    tm = dt_ref.shape[0]          # rows in this tile
    t_pad = proj_ref.shape[0]     # 256 (K, multiple of 128)

    # onehot[b, t] = (t == delta_t[b])  ->  out = onehot @ proj  (exact row selection)
    iota = lax.broadcasted_iota(jnp.int32, (tm, t_pad), 1)       # (tm, t_pad)
    onehot = (iota == dt_ref[...]).astype(jnp.float32)           # exact 0/1 rows

    # Single full-width (128-lane) store; the only matmul in the kernel.
    out_ref[...] = jnp.dot(onehot, proj_ref[...],
                           preferred_element_type=jnp.float32)


def _round_up(x, m):
    return ((x + m - 1) // m) * m


def relative_temporal_encoding(delta_t, proj, *, tile_m=TILE_M):
    """delta_t: (B,) int32 -> (B, dim) f32 == base[delta_t] @ W.T + b (W, b folded into proj)."""
    B = delta_t.shape[0]
    t_pad, dim = proj.shape

    # Tile the batch dimension: small batches stay a single invocation (tm rounded to a
    # sublane multiple), large batches get a parallel grid of 256-row tiles.
    tm = min(tile_m, _round_up(B, 8))
    b_pad = _round_up(B, tm)
    grid = (b_pad // tm,)

    # Pad indices; padded rows select proj[0] (valid) and are sliced off below.
    dt = jnp.zeros((b_pad, 1), jnp.int32).at[:B, 0].set(delta_t.astype(jnp.int32))

    cost = pl.CostEstimate(
        flops=2 * b_pad * t_pad * dim,
        transcendentals=0,
        bytes_accessed=proj.size * 4 + dt.size * 4 + b_pad * dim * 4,
    )

    out = pl.pallas_call(
        rte_kernel,
        out_shape=jax.ShapeDtypeStruct((b_pad, dim), jnp.float32),
        grid=grid,
        in_specs=[
            pl.BlockSpec((tm, 1), lambda i: (i, 0)),        # this tile's indices
            pl.BlockSpec((t_pad, dim), lambda i: (0, 0)),   # full fused table, every step
        ],
        out_specs=pl.BlockSpec((tm, dim), lambda i: (i, 0)),
        compiler_params=pltpu.CompilerParams(
            dimension_semantics=("parallel",)),              # 2-TC sharding on v7x
        cost_estimate=cost,
    )(dt, proj)
    return out[:B]


def make_base(t_max, dim):
    """Host-side replica of the module's __init__ buffer (sin on even cols, cos on odd)."""
    t = jnp.arange(t_max, dtype=jnp.float32)[:, None]                      # (t_max, 1)
    denom = jnp.exp(jnp.arange(dim, dtype=jnp.float32) * math.log(10000.0) / dim)
    base = t / denom                                                       # (t_max, dim)
    base = base.at[:, 0::2].set(jnp.sin(base[:, 0::2]))
    base = base.at[:, 1::2].set(jnp.cos(base[:, 1::2]))
    return base


def make_fused_table(base, w_t, b, t_pad=T_PAD):
    """proj[t] = base[t] @ W.T + b, zero-padded to t_pad rows (init-time constant)."""
    proj = jnp.dot(base, w_t, precision=lax.Precision.HIGHEST) + b         # (t_max, dim)
    t_max, dim = base.shape
    return jnp.zeros((t_pad, dim), jnp.float32).at[:t_max].set(proj)


def reference(delta_t, base, w_t, b):
    """Pure-JAX reference mirroring the PyTorch forward."""
    return jnp.dot(base[delta_t], w_t, precision=lax.Precision.HIGHEST) + b


if __name__ == "__main__":
    key = jax.random.PRNGKey(0)
    k_dt, k_dt2, k_w, k_b = jax.random.split(key, 4)

    base = make_base(T_MAX, DIM)                                           # (240, 128)

    # nn.Linear(dim, dim) weights, pre-transposed as (dim, dim) so y = x @ w_t + b.
    lim = 1.0 / math.sqrt(DIM)
    w_t = jax.random.uniform(k_w, (DIM, DIM), jnp.float32, -lim, lim)
    b = jax.random.uniform(k_b, (1, DIM), jnp.float32, -lim, lim)

    proj = make_fused_table(base, w_t, b)                                  # (256, 128)

    # Small-batch path (single invocation).
    delta_t = jax.random.randint(k_dt, (BATCH,), 0, T_MAX, dtype=jnp.int32)
    out = jax.block_until_ready(relative_temporal_encoding(delta_t, proj))
    ref = reference(delta_t, base, w_t, b)
    assert out.shape == (BATCH, DIM)
    assert jnp.max(jnp.abs(out - ref)) < 1e-3, "small-batch mismatch vs reference"

    # Batched path (grid over 256-row M tiles, parallel across TensorCores).
    delta_t_big = jax.random.randint(k_dt2, (BATCH_BIG,), 0, T_MAX, dtype=jnp.int32)
    out_big = jax.block_until_ready(relative_temporal_encoding(delta_t_big, proj))
    ref_big = reference(delta_t_big, base, w_t, b)
    assert out_big.shape == (BATCH_BIG, DIM)
    assert jnp.max(jnp.abs(out_big - ref_big)) < 1e-3, "batched mismatch vs reference"

    print("KERNEL_OK")
</pallas_src>

<mosaic_0001>
module attributes {stable_mosaic.version = 11 : i64} {
  func.func @rte_kernel(%arg0: i32, %arg1: memref<16x1xi32, #tpu.memory_space<vmem>>, %arg2: memref<256x128xf32, #tpu.memory_space<vmem>>, %arg3: memref<16x128xf32, #tpu.memory_space<vmem>>) attributes {dimension_semantics = [#tpu.dimension_semantics<parallel>], iteration_bounds = array<i64: 1>, scalar_prefetch = 0 : i64, scratch_operands = 0 : i64, tpu.core_type = #tpu.core_type<tc>, window_params = [{transform_indices = @transform_0, window_bounds = array<i64: 16, 1>}, {pipeline_mode = #tpu.pipeline_mode<synchronous>, transform_indices = @transform_1, window_bounds = array<i64: 256, 128>}, {transform_indices = @transform_2, window_bounds = array<i64: 16, 128>}]} {
    %0 = tpu.iota {dimensions = array<i32: 1>} : vector<16x256xi32>
    %c0 = arith.constant 0 : index
    %c0_0 = arith.constant 0 : index
    %1 = vector.load %arg1[%c0, %c0_0] : memref<16x1xi32, #tpu.memory_space<vmem>>, vector<16x1xi32>
    %2 = vector.broadcast %1 : vector<16x1xi32> to vector<16x256xi32>
    %3 = arith.cmpi eq, %0, %2 : vector<16x256xi32>
    %4 = arith.extui %3 : vector<16x256xi1> to vector<16x256xi32>
    %5 = arith.sitofp %4 : vector<16x256xi32> to vector<16x256xf32>
    %c0_1 = arith.constant 0 : index
    %c0_2 = arith.constant 0 : index
    %6 = vector.load %arg2[%c0_1, %c0_2] : memref<256x128xf32, #tpu.memory_space<vmem>>, vector<256x128xf32>
    %cst = arith.constant dense<0.000000e+00> : vector<16x128xf32>
    %7 = tpu.matmul %5, %6, %cst {dimension_numbers = #tpu.dot_dimension_numbers<[1], [0], [0], [1], [0, 0, 1, 1], [], []>} : vector<16x256xf32>, vector<256x128xf32>, vector<16x128xf32> -> vector<16x128xf32>
    %c0_3 = arith.constant 0 : index
    %c0_4 = arith.constant 0 : index
    %8 = vector.load %arg3[%c0_3, %c0_4] : memref<16x128xf32, #tpu.memory_space<vmem>>, vector<16x128xf32>
    tpu.vector_store %arg3[%c0_3, %c0_4], %7 {strides = array<i32>} : memref<16x128xf32, #tpu.memory_space<vmem>>, vector<16x128xf32>,
    return
  }
  func.func @transform_0(%arg0: i32) -> (i32, i32) {
    %c0_i32 = arith.constant 0 : i32
    %c0_i32_0 = arith.constant 0 : i32
    return %arg0, %c0_i32 : i32, i32
  }
  func.func @transform_1(%arg0: i32) -> (i32, i32) {
    %c0_i32 = arith.constant 0 : i32
    %c0_i32_0 = arith.constant 0 : i32
    %c0_i32_1 = arith.constant 0 : i32
    return %c0_i32, %c0_i32_0 : i32, i32
  }
  func.func @transform_2(%arg0: i32) -> (i32, i32) {
    %c0_i32 = arith.constant 0 : i32
    %c0_i32_0 = arith.constant 0 : i32
    return %arg0, %c0_i32 : i32, i32
  }
}

</mosaic_0001>

<bundles_post_ra>
// kernel: tpu_custom_call.1
= control target key start
LH: loop header
LB: loop body
LE: loop exit
PB: predicated region body
PF: predicated region fallthrough
CT: control target
= control target key end

     0   :  { %7 = vsyncpa [#allocation3], 0  ;;  %s288_s0 = inlined_call_operand.vmem [shape: s32[16,1], index: 0, kind: input, shape index: {}]   ;;  %s289_s1 = inlined_call_operand.hbm [shape: f32[256,128], index: 1, kind: input, shape index: {}]   ;;  %s290_s2 = inlined_call_operand.hbm [shape: f32[16,128], index: 2, kind: output, shape index: {}]  }
   0x1   :  { %8 = vsyncpa [#allocation4], 0  ;;  %s15_s11 = sshll.u32 %s289_s1, 4  ;;  %s249_s12 = smov [#allocation2]   ;;  %s16_s11 = int_to_ptr.hbm [resolvable:$true] %s15_s11 }
   0x2   :  { %s17_s13 = sshll.u32 %s249_s12, 4  ;;  %s250_s14 = smov 128   ;;  %s18_s13 = int_to_ptr.vmem [resolvable:$true] %s17_s13 }
   0x3   :  { %s251_s15 = smov 8  }
   0x4   :  { %23 = dma.hbm_to_vmem [thread:$0]  %s16_s11, 4096, %s18_s13, [#allocation3], %s250_s14, %s250_s14, %s251_s15  }
   0x5   :  { %245 = dma.done.wait [#allocation3], 4096  }
   0x6   :  { %246 = vsyncadd [#allocation3], 4294963200  ;;  %v252_v0 = vmov 0   ;;  %v32_v1 = vld [vmem:[%s288_s0 + $0x8] sm:$0xff]  ;;  %v66_v2 = vld [vmem:[#allocation2 + $0x78] sm:$0xff]  ;;  %v28_v35 = vlaneseq  ;;  %v253_v39 = vmov 1.0  }
   0x7   :  { %196 = vset.pattern.permute.xlu0 %v252_v0  ;;  %158 = vmatpush.msra.mxu2 %v66_v2  ;;  %v82_v3 = vld [vmem:[#allocation2 + $0xf8] sm:$0xff]  ;;  %v65_v4 = vld [vmem:[#allocation2 + $0x70] sm:$0xff]  ;;  %v64_v6 = vld [vmem:[#allocation2 + $0x68] sm:$0xff]  ;;  %s137_s22 = sshll.u32 %s290_s2, 4  ;;  %s138_s22 = int_to_ptr.hbm [resolvable:$true] %s137_s22 }
   0x8   :  { %37 = vperm.xlu0 %196, %v32_v1   ;;  %v81_v5 = vld [vmem:[#allocation2 + $0xf0] sm:$0xff]  ;;  %174 = vmatpush.msra.mxu3 %v82_v3  ;;  %v80_v7 = vld [vmem:[#allocation2 + $0xe8] sm:$0xff]  ;;  %v63_v8 = vld [vmem:[#allocation2 + $0x60] sm:$0xff]  ;;  %v29_v36 = vand.u32 127, %v28_v35 }
   0x9   :  { %83 = vmatpush.msra.mxu0 %v66_v2  ;;  %159 = vmatpush.msra.mxu2 %v65_v4  ;;  %v79_v9 = vld [vmem:[#allocation2 + $0xe0] sm:$0xff]  ;;  %v62_v11 = vld [vmem:[#allocation2 + $0x58] sm:$0xff]  ;;  %v61_v13 = vld [vmem:[#allocation2 + $0x50] sm:$0xff] }
   0xa   :  { %106 = vmatpush.msra.mxu1 %v82_v3  ;;  %175 = vmatpush.msra.mxu3 %v81_v5  ;;  %v31_v10 = vld [vmem:[%s288_s0] sm:$0xff]  ;;  %v78_v12 = vld [vmem:[#allocation2 + $0xd8] sm:$0xff]  ;;  %v77_v14 = vld [vmem:[#allocation2 + $0xd0] sm:$0xff]  ;;  %v30_v37 = vadd.s32 128, %v29_v36  ;;  %s254_s0 = smov [#allocation5]  }
   0xb   :  { %84 = vmatpush.msra.mxu0 %v65_v4  ;;  %160 = vmatpush.msra.mxu2 %v64_v6  ;;  %v60_v15 = vld [vmem:[#allocation2 + $0x48] sm:$0xff]  ;;  %v59_v17 = vld [vmem:[#allocation2 + $0x40] sm:$0xff]  ;;  %v58_v19 = vld [vmem:[#allocation2 + $0x38] sm:$0xff]  ;;  %s135_s19 = sshll.u32 %s254_s0, 4  ;;  %s136_s19 = int_to_ptr.vmem [resolvable:$true] %s135_s19 }
   0xc   :  { %107 = vmatpush.msra.mxu1 %v81_v5  ;;  %176 = vmatpush.msra.mxu3 %v80_v7  ;;  %v76_v16 = vld [vmem:[#allocation2 + $0xc8] sm:$0xff]  ;;  %v75_v18 = vld [vmem:[#allocation2 + $0xc0] sm:$0xff]  ;;  %v74_v20 = vld [vmem:[#allocation2 + $0xb8] sm:$0xff] }
   0xd   :  { %85 = vmatpush.msra.mxu0 %v64_v6  ;;  %161 = vmatpush.msra.mxu2 %v63_v8  ;;  %v57_v21 = vld [vmem:[#allocation2 + $0x30] sm:$0xff]  ;;  %v56_v23 = vld [vmem:[#allocation2 + $0x28] sm:$0xff]  ;;  %v55_v25 = vld [vmem:[#allocation2 + $0x20] sm:$0xff] }
   0xe   :  { %108 = vmatpush.msra.mxu1 %v80_v7  ;;  %177 = vmatpush.msra.mxu3 %v79_v9  ;;  %v73_v22 = vld [vmem:[#allocation2 + $0xb0] sm:$0xff]  ;;  %v72_v24 = vld [vmem:[#allocation2 + $0xa8] sm:$0xff]  ;;  %v71_v26 = vld [vmem:[#allocation2 + $0xa0] sm:$0xff] }
   0xf   :  { %86 = vmatpush.msra.mxu0 %v63_v8  ;;  %162 = vmatpush.msra.mxu2 %v62_v11  ;;  %v54_v27 = vld [vmem:[#allocation2 + $0x18] sm:$0xff]  ;;  %v53_v29 = vld [vmem:[#allocation2 + $0x10] sm:$0xff]  ;;  %v52_v31 = vld [vmem:[#allocation2 + $0x8] sm:$0xff] }
  0x10   :  { %34 = vperm.xlu0 %196, %v31_v10   ;;  %178 = vmatpush.msra.mxu3 %v78_v12  ;;  %v70_v28 = vld [vmem:[#allocation2 + $0x98] sm:$0xff]  ;;  %v69_v30 = vld [vmem:[#allocation2 + $0x90] sm:$0xff]  ;;  %v68_v32 = vld [vmem:[#allocation2 + $0x88] sm:$0xff] }
  0x11   :  { %109 = vmatpush.msra.mxu1 %v79_v9  ;;  %163 = vmatpush.msra.mxu2 %v61_v13  ;;  %v51_v33 = vld [vmem:[#allocation2] sm:$0xff] }
  0x12   :  { %87 = vmatpush.msra.mxu0 %v62_v11  ;;  %179 = vmatpush.msra.mxu3 %v77_v14  ;;  %v67_v34 = vld [vmem:[#allocation2 + $0x80] sm:$0xff] }
  0x13   :  { %110 = vmatpush.msra.mxu1 %v78_v12  ;;  %164 = vmatpush.msra.mxu2 %v60_v15 }
  0x14   :  { %88 = vmatpush.msra.mxu0 %v61_v13  ;;  %180 = vmatpush.msra.mxu3 %v76_v16 }
  0x15   :  { %111 = vmatpush.msra.mxu1 %v77_v14  ;;  %165 = vmatpush.msra.mxu2 %v59_v17 }
  0x16   :  { %89 = vmatpush.msra.mxu0 %v60_v15  ;;  %181 = vmatpush.msra.mxu3 %v75_v18 }
  0x17   :  { %112 = vmatpush.msra.mxu1 %v76_v16  ;;  %166 = vmatpush.msra.mxu2 %v58_v19 }
  0x18   :  { %90 = vmatpush.msra.mxu0 %v59_v17  ;;  %182 = vmatpush.msra.mxu3 %v74_v20 }
  0x19   :  { %113 = vmatpush.msra.mxu1 %v75_v18  ;;  %167 = vmatpush.msra.mxu2 %v57_v21 }
  0x1a   :  { %91 = vmatpush.msra.mxu0 %v58_v19  ;;  %183 = vmatpush.msra.mxu3 %v73_v22 }
  0x1b   :  { %114 = vmatpush.msra.mxu1 %v74_v20  ;;  %168 = vmatpush.msra.mxu2 %v56_v23 }
  0x1c   :  { %92 = vmatpush.msra.mxu0 %v57_v21  ;;  %184 = vmatpush.msra.mxu3 %v72_v24 }
  0x1d   :  { %115 = vmatpush.msra.mxu1 %v73_v22  ;;  %169 = vmatpush.msra.mxu2 %v55_v25 }
  0x1e   :  { %93 = vmatpush.msra.mxu0 %v56_v23  ;;  %185 = vmatpush.msra.mxu3 %v71_v26 }
  0x1f   :  { %116 = vmatpush.msra.mxu1 %v72_v24  ;;  %170 = vmatpush.msra.mxu2 %v54_v27 }
  0x20   :  { %94 = vmatpush.msra.mxu0 %v55_v25  ;;  %186 = vmatpush.msra.mxu3 %v70_v28 }
  0x21   :  { %117 = vmatpush.msra.mxu1 %v71_v26  ;;  %171 = vmatpush.msra.mxu2 %v53_v29 }
  0x22   :  { %95 = vmatpush.msra.mxu0 %v54_v27  ;;  %187 = vmatpush.msra.mxu3 %v69_v30 }
  0x23   :  { %118 = vmatpush.msra.mxu1 %v70_v28  ;;  %172 = vmatpush.msra.mxu2 %v52_v31 }
  0x24   :  { %96 = vmatpush.msra.mxu0 %v53_v29  ;;  %188 = vmatpush.msra.mxu3 %v68_v32 }
  0x25   :  { %119 = vmatpush.msra.mxu1 %v69_v30  ;;  %173 = vmatpush.msra.mxu2 %v51_v33 }
  0x26   :  { %97 = vmatpush.msra.mxu0 %v52_v31  ;;  %189 = vmatpush.msra.mxu3 %v67_v34 }
  0x27   :  { %120 = vmatpush.msra.mxu1 %v68_v32 }
  0x28   :  { %98 = vmatpush.msra.mxu0 %v51_v33 }
  0x29   :  { %121 = vmatpush.msra.mxu1 %v67_v34 }
  0x7a   :  { %v38_v38 = vpop.permute.xlu0 %37 }
  0x7b   :  { %vm41_vm0 = vcmp.eq.s32.totalorder %v29_v36, %v38_v38  ;;  %vm42_vm1 = vcmp.eq.s32.totalorder %v30_v37, %v38_v38 }
  0x7c   :  { %155 = vmatmul.msk.f32.vlgmr.msra.gmra.mxu2 %vm41_vm0, %v253_v39  ;;  %157 = vmatmul.msk.f32.vlgmr.msra.gmra.mxu3 %vm42_vm1, %v253_v39 }
  0x82   :  { %v35_v40 = vpop.permute.xlu0 %34 }
  0x83   :  { %vm39_vm2 = vcmp.eq.s32.totalorder %v29_v36, %v35_v40  ;;  %vm40_vm3 = vcmp.eq.s32.totalorder %v30_v37, %v35_v40 }
  0x84   :  { %154 = vmatmul.msk.f32.vlgmr.msra.gmra.mxu0 %vm39_vm2, %v253_v39  ;;  %156 = vmatmul.msk.f32.vlgmr.msra.gmra.mxu1 %vm40_vm3, %v253_v39 }
  0xff   :  { %v103_v41 = vpop.f32.mrf.mxu2  ;;  %v126_v42 = vpop.f32.mrf.mxu3 }
 0x100   :  { %v127_v43 = vadd.f32 %v126_v42, %v103_v41 }
 0x101   :  { %v100_v44 = vpop.f32.mrf.mxu0  ;;  %v123_v45 = vpop.f32.mrf.mxu1 }
 0x102   :  { %130 = vst [vmem:[#allocation5 + $0x8] sm:$0xff] %v127_v43  ;;  %v124_v46 = vadd.f32 %v123_v45, %v100_v44 }
 0x104   :  { %129 = vst [vmem:[#allocation5] sm:$0xff] %v124_v46 }
 0x105   :  { %143 = dma.vmem_to_hbm [thread:$0]  %s136_s19, 256, %s138_s22, [#allocation4], %s250_s14, %s250_s14, %s251_s15  }
 0x106   :  { %247 = dma.done.wait [#allocation4], 256  }
 0x107   :  { %248 = vsyncadd [#allocation4], 4294967040 }
 0x108   :  { %148 = vsyncpa [#allocation3], 1 }
 0x109   :  { %149 = vsyncpa [#allocation4], 1 }

</bundles_post_ra>
